<compile_context>
chip_gen: v7x
topology: tpu7x:2x2x1
jax: 0.10.0
libtpu: 0.0.40
codegen_flags: <defaults>
</compile_context>

<pallas_src>
import functools

import jax
import jax.numpy as jnp
from jax import lax
from jax.experimental import pallas as pl
from jax.experimental.pallas import tpu as pltpu


def _pick_c_chunk(C, cap=128):
    """Largest divisor of C that is <= cap (bounds vreg pressure per chunk)."""
    for d in range(min(C, cap), 0, -1):
        if C % d == 0:
            return d
    return C


def _sa_kernel(w_ref, m_ref, x_ref, o_ref, *, C, H, W, c_chunk):
    # w_ref: SMEM f32[18]      conv weight, layout [c_in(2), kh(3), kw(3)]
    # m_ref: VMEM f32[4, H*W]  base masks [row>=1, row<H-1, col>=1, col<W-1]
    # x_ref: VMEM (C, H*W)     input block (batch dim squeezed by BlockSpec)
    # o_ref: VMEM (C, H*W)     output block
    HW = H * W
    n_chunks = C // c_chunk
    unroll = n_chunks <= 8

    # ---- pass 1: per-pixel channel statistics (mean & max over C) --------
    def stats_body(ci, carry):
        s, m = carry
        c0 = pl.multiple_of(ci * c_chunk, c_chunk)
        xc = x_ref[pl.ds(c0, c_chunk), :].astype(jnp.float32)
        return (s + jnp.sum(xc, axis=0, keepdims=True),
                jnp.maximum(m, jnp.max(xc, axis=0, keepdims=True)))

    sum_c, max_c = lax.fori_loop(
        0, n_chunks, stats_body,
        (jnp.zeros((1, HW), jnp.float32),
         jnp.full((1, HW), -jnp.inf, jnp.float32)),
        unroll=unroll)
    avg_c = sum_c * (1.0 / C)
    feat = jnp.concatenate([avg_c, max_c], axis=0)          # (2, HW)

    # ---- boundary masks: loaded once, shared by both channels ------------
    rmask = {-1: m_ref[0:1, :], 0: None, 1: m_ref[1:2, :]}
    cmask = {-1: m_ref[2:3, :], 0: None, 1: m_ref[3:4, :]}

    # ---- 3x3 "SAME" cross-correlation over the 2 pooled channels ---------
    # 8 rolls total on the stacked slab; each boundary mask applied once.
    acc0 = jnp.zeros((1, HW), jnp.float32)   # avg-channel taps
    acc1 = jnp.zeros((1, HW), jnp.float32)   # max-channel taps
    for dh in (-1, 0, 1):
        fh = feat if dh == 0 else pltpu.roll(feat, shift=(-dh * W) % HW, axis=1)
        for dw in (-1, 0, 1):
            sh = fh if dw == 0 else pltpu.roll(fh, shift=(-dw) % HW, axis=1)
            r, c = rmask[dh], cmask[dw]
            if r is None and c is None:
                msk = sh
            elif r is None:
                msk = sh * c
            elif c is None:
                msk = sh * r
            else:
                msk = sh * (r * c)
            k = (dh + 1) * 3 + (dw + 1)
            acc0 = acc0 + msk[0:1, :] * w_ref[k]
            acc1 = acc1 + msk[1:2, :] * w_ref[9 + k]

    # sigmoid(z) == 0.5 * tanh(z / 2) + 0.5  -> EUP transcendental, no divide
    z = acc0 + acc1
    attn = 0.5 * jnp.tanh(0.5 * z) + 0.5                    # (1, HW)

    # ---- pass 2: re-read x in C-chunks, scale by attention, store --------
    def apply_body(ci, carry):
        c0 = pl.multiple_of(ci * c_chunk, c_chunk)
        xc = x_ref[pl.ds(c0, c_chunk), :]
        o_ref[pl.ds(c0, c_chunk), :] = (
            xc.astype(jnp.float32) * attn).astype(o_ref.dtype)
        return carry

    lax.fori_loop(0, n_chunks, apply_body, 0, unroll=unroll)


def sa_module(x, conv_weight):
    """x: (N, C, H, W); conv_weight: (1, 2, 3, 3) float32 (no bias)."""
    N, C, H, W = x.shape
    HW = H * W
    x2 = x.reshape(N, C, HW)                                 # free, contiguous
    w_flat = conv_weight.reshape(-1).astype(jnp.float32)     # (18,)

    # Base boundary-validity masks for the 3x3 SAME conv (geometry only,
    # computed once outside the kernel; independent of data and weights).
    row = jnp.repeat(jnp.arange(H, dtype=jnp.int32), W)
    col = jnp.tile(jnp.arange(W, dtype=jnp.int32), H)
    base_masks = jnp.stack(
        [row >= 1, row < H - 1, col >= 1, col < W - 1],
        axis=0).astype(jnp.float32)                          # (4, HW)

    c_chunk = _pick_c_chunk(C)
    kernel = functools.partial(_sa_kernel, C=C, H=H, W=W, c_chunk=c_chunk)

    # VMEM budget: input + output blocks are double-buffered (~4x block) plus
    # masks and headroom; clamp below v7x's 64 MiB physical VMEM.
    itemsize = jnp.dtype(x.dtype).itemsize
    block_bytes = C * HW * itemsize
    vmem_limit = int(max(32 << 20, min(4 * block_bytes + (8 << 20), 60 << 20)))
    # TODO(synk): if 4*C*H*W*itemsize approaches 60 MiB (v7x), also tile C
    # across the grid (and, for large N with small images, batch-tile the
    # grid) instead of only chunking C inside the kernel.

    out = pl.pallas_call(
        kernel,
        out_shape=jax.ShapeDtypeStruct((N, C, HW), x.dtype),
        grid=(N,),
        in_specs=[
            pl.BlockSpec(memory_space=pltpu.MemorySpace.SMEM),    # weights
            pl.BlockSpec((4, HW), lambda i: (0, 0)),              # masks
            pl.BlockSpec((None, C, HW), lambda i: (i, 0, 0)),     # x
        ],
        out_specs=pl.BlockSpec((None, C, HW), lambda i: (i, 0, 0)),
        compiler_params=pltpu.CompilerParams(
            dimension_semantics=("parallel",),
            vmem_limit_bytes=vmem_limit),
    )(w_flat, base_masks, x2)
    return out.reshape(N, C, H, W)


def _reference(x, conv_weight):
    avg_c = jnp.mean(x, axis=1, keepdims=True)
    max_c = jnp.max(x, axis=1, keepdims=True)
    feat = jnp.concatenate([avg_c, max_c], axis=1)           # (N, 2, H, W)
    y = lax.conv_general_dilated(
        feat, conv_weight, window_strides=(1, 1), padding="SAME",
        dimension_numbers=("NCHW", "OIHW", "NCHW"))
    return x * jax.nn.sigmoid(y)


if __name__ == "__main__":
    key = jax.random.PRNGKey(0)
    kx, kw = jax.random.split(key)

    N, C, H, W = 2, 4, 16, 16
    x = jax.random.normal(kx, (N, C, H, W), dtype=jnp.float32)
    # deterministic synthetic conv weight (1 out, 2 in, 3x3, no bias)
    conv_w = 0.1 * jax.random.normal(kw, (1, 2, 3, 3), dtype=jnp.float32)

    out = sa_module(x, conv_w)
    out = jax.block_until_ready(out)

    ref = jax.block_until_ready(_reference(x, conv_w))
    assert out.shape == (N, C, H, W)
    assert jnp.allclose(out, ref, atol=1e-5, rtol=1e-5), "mismatch vs reference"

    print("KERNEL_OK")
</pallas_src>

<mosaic_0001>
module attributes {stable_mosaic.version = 11 : i64} {
  func.func @_sa_kernel(%arg0: i32, %arg1: memref<18xf32, #tpu.memory_space<smem>>, %arg2: memref<4x256xf32, #tpu.memory_space<vmem>>, %arg3: memref<1x4x256xf32, #tpu.memory_space<vmem>>, %arg4: memref<1x4x256xf32, #tpu.memory_space<vmem>>) attributes {dimension_semantics = [#tpu.dimension_semantics<parallel>], iteration_bounds = array<i64: 2>, scalar_prefetch = 0 : i64, scratch_operands = 0 : i64, tpu.core_type = #tpu.core_type<tc>, window_params = [{transform_indices = @transform_0, window_bounds = array<i64: 18>}, {pipeline_mode = #tpu.pipeline_mode<synchronous>, transform_indices = @transform_1, window_bounds = array<i64: 4, 256>}, {transform_indices = @transform_2, window_bounds = array<i64: 1, 4, 256>}, {transform_indices = @transform_3, window_bounds = array<i64: 1, 4, 256>}]} {
    %cst = arith.constant 0.000000e+00 : f32
    %0 = vector.broadcast %cst : f32 to vector<1x256xf32>
    %cst_0 = arith.constant 0xFF800000 : f32
    %1 = vector.broadcast %cst_0 : f32 to vector<1x256xf32>
    %c0_i32 = arith.constant 0 : i32
    %c4_i32 = arith.constant 4 : i32
    %2 = arith.muli %c0_i32, %c4_i32 : i32
    %3 = tpu.assume_multiple %2, 4 : i32
    %c0 = arith.constant 0 : index
    %4 = arith.index_cast %3 : i32 to index
    %c0_1 = arith.constant 0 : index
    %5 = vector.load %arg3[%c0, %4, %c0_1] : memref<1x4x256xf32, #tpu.memory_space<vmem>>, vector<1x4x256xf32>
    %6 = vector.shape_cast %5 : vector<1x4x256xf32> to vector<4x256xf32>
    %cst_2 = arith.constant dense<0.000000e+00> : vector<256xf32>
    %7 = vector.multi_reduction <add>, %6, %cst_2 [0] : vector<4x256xf32> to vector<256xf32>
    %8 = vector.shape_cast %7 : vector<256xf32> to vector<1x256xf32>
    %9 = arith.addf %0, %8 : vector<1x256xf32>
    %cst_3 = arith.constant dense<0xFF800000> : vector<256xf32>
    %10 = vector.multi_reduction <maximumf>, %6, %cst_3 [0] : vector<4x256xf32> to vector<256xf32>
    %11 = vector.shape_cast %10 : vector<256xf32> to vector<1x256xf32>
    %12 = arith.maximumf %1, %11 : vector<1x256xf32>
    %c1_i32 = arith.constant 1 : i32
    %cst_4 = arith.constant 2.500000e-01 : f32
    %13 = vector.broadcast %cst_4 : f32 to vector<1x256xf32>
    %14 = arith.mulf %9, %13 : vector<1x256xf32>
    %15 = tpu.concatenate %14, %12 in 0 : vector<1x256xf32>, vector<1x256xf32> -> vector<2x256xf32>
    %c0_5 = arith.constant 0 : index
    %c0_6 = arith.constant 0 : index
    %16 = vector.load %arg2[%c0_5, %c0_6] : memref<4x256xf32, #tpu.memory_space<vmem>>, vector<1x256xf32>
    %c1 = arith.constant 1 : index
    %c0_7 = arith.constant 0 : index
    %17 = vector.load %arg2[%c1, %c0_7] : memref<4x256xf32, #tpu.memory_space<vmem>>, vector<1x256xf32>
    %c2 = arith.constant 2 : index
    %c0_8 = arith.constant 0 : index
    %18 = vector.load %arg2[%c2, %c0_8] : memref<4x256xf32, #tpu.memory_space<vmem>>, vector<1x256xf32>
    %c3 = arith.constant 3 : index
    %c0_9 = arith.constant 0 : index
    %19 = vector.load %arg2[%c3, %c0_9] : memref<4x256xf32, #tpu.memory_space<vmem>>, vector<1x256xf32>
    %cst_10 = arith.constant 0.000000e+00 : f32
    %20 = vector.broadcast %cst_10 : f32 to vector<1x256xf32>
    %cst_11 = arith.constant 0.000000e+00 : f32
    %21 = vector.broadcast %cst_11 : f32 to vector<1x256xf32>
    %c16_i32 = arith.constant 16 : i32
    %22 = tpu.dynamic_rotate %15 by %c16_i32 dim 1 : vector<2x256xf32>, i32 -> vector<2x256xf32>
    %c1_i32_12 = arith.constant 1 : i32
    %23 = tpu.dynamic_rotate %22 by %c1_i32_12 dim 1 : vector<2x256xf32>, i32 -> vector<2x256xf32>
    %24 = arith.mulf %16, %18 : vector<1x256xf32>
    %25 = vector.broadcast %24 : vector<1x256xf32> to vector<2x256xf32>
    %26 = arith.mulf %23, %25 : vector<2x256xf32>
    %27 = vector.extract_strided_slice %26 {offsets = [0, 0], sizes = [1, 256], strides = [1, 1]} : vector<2x256xf32> to vector<1x256xf32>
    %c0_13 = arith.constant 0 : index
    %28 = memref.load %arg1[%c0_13] : memref<18xf32, #tpu.memory_space<smem>>
    %29 = vector.broadcast %28 : f32 to vector<1x256xf32>
    %30 = arith.mulf %27, %29 : vector<1x256xf32>
    %31 = arith.addf %20, %30 : vector<1x256xf32>
    %32 = vector.extract_strided_slice %26 {offsets = [1, 0], sizes = [1, 256], strides = [1, 1]} : vector<2x256xf32> to vector<1x256xf32>
    %c9 = arith.constant 9 : index
    %33 = memref.load %arg1[%c9] : memref<18xf32, #tpu.memory_space<smem>>
    %34 = vector.broadcast %33 : f32 to vector<1x256xf32>
    %35 = arith.mulf %32, %34 : vector<1x256xf32>
    %36 = arith.addf %21, %35 : vector<1x256xf32>
    %37 = vector.broadcast %16 : vector<1x256xf32> to vector<2x256xf32>
    %38 = arith.mulf %22, %37 : vector<2x256xf32>
    %39 = vector.extract_strided_slice %38 {offsets = [0, 0], sizes = [1, 256], strides = [1, 1]} : vector<2x256xf32> to vector<1x256xf32>
    %c1_14 = arith.constant 1 : index
    %40 = memref.load %arg1[%c1_14] : memref<18xf32, #tpu.memory_space<smem>>
    %41 = vector.broadcast %40 : f32 to vector<1x256xf32>
    %42 = arith.mulf %39, %41 : vector<1x256xf32>
    %43 = arith.addf %31, %42 : vector<1x256xf32>
    %44 = vector.extract_strided_slice %38 {offsets = [1, 0], sizes = [1, 256], strides = [1, 1]} : vector<2x256xf32> to vector<1x256xf32>
    %c10 = arith.constant 10 : index
    %45 = memref.load %arg1[%c10] : memref<18xf32, #tpu.memory_space<smem>>
    %46 = vector.broadcast %45 : f32 to vector<1x256xf32>
    %47 = arith.mulf %44, %46 : vector<1x256xf32>
    %48 = arith.addf %36, %47 : vector<1x256xf32>
    %c255_i32 = arith.constant 255 : i32
    %49 = tpu.dynamic_rotate %22 by %c255_i32 dim 1 : vector<2x256xf32>, i32 -> vector<2x256xf32>
    %50 = arith.mulf %16, %19 : vector<1x256xf32>
    %51 = vector.broadcast %50 : vector<1x256xf32> to vector<2x256xf32>
    %52 = arith.mulf %49, %51 : vector<2x256xf32>
    %53 = vector.extract_strided_slice %52 {offsets = [0, 0], sizes = [1, 256], strides = [1, 1]} : vector<2x256xf32> to vector<1x256xf32>
    %c2_15 = arith.constant 2 : index
    %54 = memref.load %arg1[%c2_15] : memref<18xf32, #tpu.memory_space<smem>>
    %55 = vector.broadcast %54 : f32 to vector<1x256xf32>
    %56 = arith.mulf %53, %55 : vector<1x256xf32>
    %57 = arith.addf %43, %56 : vector<1x256xf32>
    %58 = vector.extract_strided_slice %52 {offsets = [1, 0], sizes = [1, 256], strides = [1, 1]} : vector<2x256xf32> to vector<1x256xf32>
    %c11 = arith.constant 11 : index
    %59 = memref.load %arg1[%c11] : memref<18xf32, #tpu.memory_space<smem>>
    %60 = vector.broadcast %59 : f32 to vector<1x256xf32>
    %61 = arith.mulf %58, %60 : vector<1x256xf32>
    %62 = arith.addf %48, %61 : vector<1x256xf32>
    %c1_i32_16 = arith.constant 1 : i32
    %63 = tpu.dynamic_rotate %15 by %c1_i32_16 dim 1 : vector<2x256xf32>, i32 -> vector<2x256xf32>
    %64 = vector.broadcast %18 : vector<1x256xf32> to vector<2x256xf32>
    %65 = arith.mulf %63, %64 : vector<2x256xf32>
    %66 = vector.extract_strided_slice %65 {offsets = [0, 0], sizes = [1, 256], strides = [1, 1]} : vector<2x256xf32> to vector<1x256xf32>
    %c3_17 = arith.constant 3 : index
    %67 = memref.load %arg1[%c3_17] : memref<18xf32, #tpu.memory_space<smem>>
    %68 = vector.broadcast %67 : f32 to vector<1x256xf32>
    %69 = arith.mulf %66, %68 : vector<1x256xf32>
    %70 = arith.addf %57, %69 : vector<1x256xf32>
    %71 = vector.extract_strided_slice %65 {offsets = [1, 0], sizes = [1, 256], strides = [1, 1]} : vector<2x256xf32> to vector<1x256xf32>
    %c12 = arith.constant 12 : index
    %72 = memref.load %arg1[%c12] : memref<18xf32, #tpu.memory_space<smem>>
    %73 = vector.broadcast %72 : f32 to vector<1x256xf32>
    %74 = arith.mulf %71, %73 : vector<1x256xf32>
    %75 = arith.addf %62, %74 : vector<1x256xf32>
    %76 = vector.extract_strided_slice %15 {offsets = [0, 0], sizes = [1, 256], strides = [1, 1]} : vector<2x256xf32> to vector<1x256xf32>
    %c4 = arith.constant 4 : index
    %77 = memref.load %arg1[%c4] : memref<18xf32, #tpu.memory_space<smem>>
    %78 = vector.broadcast %77 : f32 to vector<1x256xf32>
    %79 = arith.mulf %76, %78 : vector<1x256xf32>
    %80 = arith.addf %70, %79 : vector<1x256xf32>
    %81 = vector.extract_strided_slice %15 {offsets = [1, 0], sizes = [1, 256], strides = [1, 1]} : vector<2x256xf32> to vector<1x256xf32>
    %c13 = arith.constant 13 : index
    %82 = memref.load %arg1[%c13] : memref<18xf32, #tpu.memory_space<smem>>
    %83 = vector.broadcast %82 : f32 to vector<1x256xf32>
    %84 = arith.mulf %81, %83 : vector<1x256xf32>
    %85 = arith.addf %75, %84 : vector<1x256xf32>
    %c255_i32_18 = arith.constant 255 : i32
    %86 = tpu.dynamic_rotate %15 by %c255_i32_18 dim 1 : vector<2x256xf32>, i32 -> vector<2x256xf32>
    %87 = vector.broadcast %19 : vector<1x256xf32> to vector<2x256xf32>
    %88 = arith.mulf %86, %87 : vector<2x256xf32>
    %89 = vector.extract_strided_slice %88 {offsets = [0, 0], sizes = [1, 256], strides = [1, 1]} : vector<2x256xf32> to vector<1x256xf32>
    %c5 = arith.constant 5 : index
    %90 = memref.load %arg1[%c5] : memref<18xf32, #tpu.memory_space<smem>>
    %91 = vector.broadcast %90 : f32 to vector<1x256xf32>
    %92 = arith.mulf %89, %91 : vector<1x256xf32>
    %93 = arith.addf %80, %92 : vector<1x256xf32>
    %94 = vector.extract_strided_slice %88 {offsets = [1, 0], sizes = [1, 256], strides = [1, 1]} : vector<2x256xf32> to vector<1x256xf32>
    %c14 = arith.constant 14 : index
    %95 = memref.load %arg1[%c14] : memref<18xf32, #tpu.memory_space<smem>>
    %96 = vector.broadcast %95 : f32 to vector<1x256xf32>
    %97 = arith.mulf %94, %96 : vector<1x256xf32>
    %98 = arith.addf %85, %97 : vector<1x256xf32>
    %c240_i32 = arith.constant 240 : i32
    %99 = tpu.dynamic_rotate %15 by %c240_i32 dim 1 : vector<2x256xf32>, i32 -> vector<2x256xf32>
    %c1_i32_19 = arith.constant 1 : i32
    %100 = tpu.dynamic_rotate %99 by %c1_i32_19 dim 1 : vector<2x256xf32>, i32 -> vector<2x256xf32>
    %101 = arith.mulf %17, %18 : vector<1x256xf32>
    %102 = vector.broadcast %101 : vector<1x256xf32> to vector<2x256xf32>
    %103 = arith.mulf %100, %102 : vector<2x256xf32>
    %104 = vector.extract_strided_slice %103 {offsets = [0, 0], sizes = [1, 256], strides = [1, 1]} : vector<2x256xf32> to vector<1x256xf32>
    %c6 = arith.constant 6 : index
    %105 = memref.load %arg1[%c6] : memref<18xf32, #tpu.memory_space<smem>>
    %106 = vector.broadcast %105 : f32 to vector<1x256xf32>
    %107 = arith.mulf %104, %106 : vector<1x256xf32>
    %108 = arith.addf %93, %107 : vector<1x256xf32>
    %109 = vector.extract_strided_slice %103 {offsets = [1, 0], sizes = [1, 256], strides = [1, 1]} : vector<2x256xf32> to vector<1x256xf32>
    %c15 = arith.constant 15 : index
    %110 = memref.load %arg1[%c15] : memref<18xf32, #tpu.memory_space<smem>>
    %111 = vector.broadcast %110 : f32 to vector<1x256xf32>
    %112 = arith.mulf %109, %111 : vector<1x256xf32>
    %113 = arith.addf %98, %112 : vector<1x256xf32>
    %114 = vector.broadcast %17 : vector<1x256xf32> to vector<2x256xf32>
    %115 = arith.mulf %99, %114 : vector<2x256xf32>
    %116 = vector.extract_strided_slice %115 {offsets = [0, 0], sizes = [1, 256], strides = [1, 1]} : vector<2x256xf32> to vector<1x256xf32>
    %c7 = arith.constant 7 : index
    %117 = memref.load %arg1[%c7] : memref<18xf32, #tpu.memory_space<smem>>
    %118 = vector.broadcast %117 : f32 to vector<1x256xf32>
    %119 = arith.mulf %116, %118 : vector<1x256xf32>
    %120 = arith.addf %108, %119 : vector<1x256xf32>
    %121 = vector.extract_strided_slice %115 {offsets = [1, 0], sizes = [1, 256], strides = [1, 1]} : vector<2x256xf32> to vector<1x256xf32>
    %c16 = arith.constant 16 : index
    %122 = memref.load %arg1[%c16] : memref<18xf32, #tpu.memory_space<smem>>
    %123 = vector.broadcast %122 : f32 to vector<1x256xf32>
    %124 = arith.mulf %121, %123 : vector<1x256xf32>
    %125 = arith.addf %113, %124 : vector<1x256xf32>
    %c255_i32_20 = arith.constant 255 : i32
    %126 = tpu.dynamic_rotate %99 by %c255_i32_20 dim 1 : vector<2x256xf32>, i32 -> vector<2x256xf32>
    %127 = arith.mulf %17, %19 : vector<1x256xf32>
    %128 = vector.broadcast %127 : vector<1x256xf32> to vector<2x256xf32>
    %129 = arith.mulf %126, %128 : vector<2x256xf32>
    %130 = vector.extract_strided_slice %129 {offsets = [0, 0], sizes = [1, 256], strides = [1, 1]} : vector<2x256xf32> to vector<1x256xf32>
    %c8 = arith.constant 8 : index
    %131 = memref.load %arg1[%c8] : memref<18xf32, #tpu.memory_space<smem>>
    %132 = vector.broadcast %131 : f32 to vector<1x256xf32>
    %133 = arith.mulf %130, %132 : vector<1x256xf32>
    %134 = arith.addf %120, %133 : vector<1x256xf32>
    %135 = vector.extract_strided_slice %129 {offsets = [1, 0], sizes = [1, 256], strides = [1, 1]} : vector<2x256xf32> to vector<1x256xf32>
    %c17 = arith.constant 17 : index
    %136 = memref.load %arg1[%c17] : memref<18xf32, #tpu.memory_space<smem>>
    %137 = vector.broadcast %136 : f32 to vector<1x256xf32>
    %138 = arith.mulf %135, %137 : vector<1x256xf32>
    %139 = arith.addf %125, %138 : vector<1x256xf32>
    %140 = arith.addf %134, %139 : vector<1x256xf32>
    %cst_21 = arith.constant 5.000000e-01 : f32
    %141 = vector.broadcast %cst_21 : f32 to vector<1x256xf32>
    %142 = arith.mulf %141, %140 : vector<1x256xf32>
    %143 = math.tanh %142 : vector<1x256xf32>
    %cst_22 = arith.constant 5.000000e-01 : f32
    %144 = vector.broadcast %cst_22 : f32 to vector<1x256xf32>
    %145 = arith.mulf %144, %143 : vector<1x256xf32>
    %cst_23 = arith.constant 5.000000e-01 : f32
    %146 = vector.broadcast %cst_23 : f32 to vector<1x256xf32>
    %147 = arith.addf %145, %146 : vector<1x256xf32>
    %c0_i32_24 = arith.constant 0 : i32
    %c4_i32_25 = arith.constant 4 : i32
    %148 = arith.muli %c0_i32_24, %c4_i32_25 : i32
    %149 = tpu.assume_multiple %148, 4 : i32
    %c0_26 = arith.constant 0 : index
    %150 = arith.index_cast %149 : i32 to index
    %c0_27 = arith.constant 0 : index
    %151 = vector.load %arg3[%c0_26, %150, %c0_27] : memref<1x4x256xf32, #tpu.memory_space<vmem>>, vector<1x4x256xf32>
    %152 = vector.shape_cast %151 : vector<1x4x256xf32> to vector<4x256xf32>
    %153 = vector.broadcast %147 : vector<1x256xf32> to vector<4x256xf32>
    %154 = arith.mulf %152, %153 : vector<4x256xf32>
    %c0_28 = arith.constant 0 : index
    %155 = arith.index_cast %149 : i32 to index
    %c0_29 = arith.constant 0 : index
    %156 = vector.load %arg4[%c0_28, %155, %c0_29] : memref<1x4x256xf32, #tpu.memory_space<vmem>>, vector<1x4x256xf32>
    %157 = vector.shape_cast %156 : vector<1x4x256xf32> to vector<4x256xf32>
    %158 = vector.shape_cast %154 : vector<4x256xf32> to vector<1x4x256xf32>
    tpu.vector_store %arg4[%c0_28, %155, %c0_29], %158 {strides = array<i32>} : memref<1x4x256xf32, #tpu.memory_space<vmem>>, vector<1x4x256xf32>,
    %c1_i32_30 = arith.constant 1 : i32
    return
  }
  func.func @transform_0(%arg0: i32) -> i32 {
    %c0_i32 = arith.constant 0 : i32
    %c0_i32_0 = arith.constant 0 : i32
    return %c0_i32 : i32
  }
  func.func @transform_1(%arg0: i32) -> (i32, i32) {
    %c0_i32 = arith.constant 0 : i32
    %c0_i32_0 = arith.constant 0 : i32
    %c0_i32_1 = arith.constant 0 : i32
    return %c0_i32, %c0_i32_0 : i32, i32
  }
  func.func @transform_2(%arg0: i32) -> (i32, i32, i32) {
    %c0_i32 = arith.constant 0 : i32
    %c0_i32_0 = arith.constant 0 : i32
    %c0_i32_1 = arith.constant 0 : i32
    return %arg0, %c0_i32, %c0_i32_0 : i32, i32, i32
  }
  func.func @transform_3(%arg0: i32) -> (i32, i32, i32) {
    %c0_i32 = arith.constant 0 : i32
    %c0_i32_0 = arith.constant 0 : i32
    %c0_i32_1 = arith.constant 0 : i32
    return %arg0, %c0_i32, %c0_i32_0 : i32, i32, i32
  }
}

</mosaic_0001>

<bundles_post_ra>
// kernel: tpu_custom_call.1
= control target key start
LH: loop header
LB: loop body
LE: loop exit
PB: predicated region body
PF: predicated region fallthrough
CT: control target
= control target key end

     0   :  { %8 = vsyncpa [#allocation5], 0  ;;  %s1409_s0 = inlined_call_operand.hbm [shape: f32[18], index: 0, kind: input, shape index: {}]   ;;  %s1410_s1 = inlined_call_operand.hbm [shape: f32[4,256], index: 1, kind: input, shape index: {}]   ;;  %s1411_s2 = inlined_call_operand.hbm [shape: f32[2,4,256], index: 2, kind: input, shape index: {}]   ;;  %s1412_s3 = inlined_call_operand.hbm [shape: f32[2,4,256], index: 3, kind: output, shape index: {}]  }
   0x1   :  { %9 = vsyncpa [#allocation3], 0 }
   0x2   :  { %10 = vsyncpa [#allocation8], 0 }
   0x3   :  { %12 = vsyncpa [#allocation8 + $0x1], 0 }
   0x4   :  { %13 = vsyncpa [#allocation4], 0 }
   0x5   :  { %15 = vsyncpa [#allocation4 + $0x1], 0  ;;  %s961_s12 = smov 0   ;;  %s963_s13 = smov 0  }
   0x6   :  { %s965_s14 = smov 0   ;;  %s967_s15 = smov 0  }
   0x7 LB: > { %s982_s16 = sadd.s32 4294967295, %s931_s15   ;;  %s673_s17 = sadd.s32 4294967294, %s931_s15   ;;  %s931_s15 = sphi %s967_s15, %s1435_s15   ;;  %s927_s14 = sphi %s965_s14, %s1434_s14   ;;  %s923_s13 = sphi %s963_s13, %s1433_s13   ;;  %s919_s12 = sphi %s961_s12, %s1432_s12  }
   0x8   : > { %p83_p0 = scmp.ne.s32.totalorder %s923_s13, %s919_s12  ;;  %p1413_p1 = scmp.eq.s32.totalorder %s982_s16, 0 }
   0x9   : > { %p113_p3 = scmp.eq.s32.totalorder %s673_s17, 1  ;;  %p674_p5 = scmp.ge.s32.totalorder %s931_s15, 1 }
   0xa   : > { %p991_p4 = por %p1413_p1, %p83_p0  ;;  %p120_p7 = scmp.lt.s32.totalorder %s931_s15, 3 }
   0xb   : > { %p996_p6 = por %p113_p3, %p83_p0  ;;  %s933_s21 = smov [#allocation6]  }
   0xc   : > { %s1416_s18 = scalar_select %p991_p4, 1, 0 }
   0xd   : > { %s1417_s19 = scalar_select %p996_p6, 1, 0 }
   0xe   : > { %p1001_p8 = pnand %p674_p5, %p120_p7  ;;  %s142_s22 = sshll.u32 %s933_s21, 4  ;;  %s1008_s22 = int_to_ptr.vmem [resolvable:$true] %s142_s22 }
   0xf   : > { %s1017_s24 = sadd.s32 1, %s931_s15   ;;  %s70_s26 = sadd.s32 1, %s927_s14 }
  0x10   : > { %p722_p10 = pneg %p1001_p8  ;;  %s67_s25 = ssub.s32 %s931_s15, %s1017_s24 }
  0x11   : > { %p1022_p12 = scmp.eq.s32.totalorder %s67_s25, 0  ;;  %s786_s30 = scalar_lea.hbm %s1409_s0, 16 }
  0x12   : > { %p1012_p11 = pnand %p722_p10, %p1413_p1  ;;  %p787_p13 = scmp.ne.s32.totalorder %s1409_s0, %s786_s30 }
  0x13   : > { %p793_p7 = scmp.lt.u32.totalorder %s786_s30, %s1409_s0 }
  0x14   : > { %p788_p0 = pneg %p1012_p11 }
  0x16   : > { %p789_p3 = pnand %p788_p0, %p787_p13 }
  0x18   : > { %p790_p5 = pneg %p789_p3 }
  0x1a   : > { %p795_p10 = pnand %p793_p7, %p790_p5 }
  0x1c   : > { %798 = shalt.err (!%p795_p10)
}
  0x1d   : > { %s934_s8 = smov [#allocation2]   ;;  %s799_s21 = scalar_lea.hbm %s1410_s1, 128 }
  0x1e   : > { %725 = dma.hbm_to_smem (!%p1012_p11), %s1409_s0, 16, %s934_s8, [#allocation5]  }
  0x1f   : > { %p800_p13 = scmp.ne.s32.totalorder %s1410_s1, %s799_s21  ;;  %p806_p7 = scmp.lt.u32.totalorder %s799_s21, %s1410_s1 }
  0x21   : > { %p802_p3 = pnand %p800_p13, %p788_p0 }
  0x23   : > { %p803_p5 = pneg %p802_p3 }
  0x25   : > { %p808_p10 = pnand %p806_p7, %p803_p5 }
  0x27   : > { %811 = shalt.err (!%p808_p10)
}
  0x28   : > { %s812_s4 = scalar_lea.vmem %s1008_s22, 128  ;;  %p820_p6 = scmp.lt.s32.totalorder %s1008_s22, %s1008_s22 }
  0x29   : > { %p813_p9 = scmp.ne.s32.totalorder %s1008_s22, %s812_s4  ;;  %p821_p13 = scmp.lt.s32.totalorder %s812_s4, %s812_s4 }
  0x2b   : > { %p815_p1 = pnand %p813_p9, %p788_p0  ;;  %p822_p3 = por %p821_p13, %p820_p6 }
  0x2d   : > { %p816_p2 = pneg %p815_p1 }
  0x2f   : > { %p823_p4 = pnand %p822_p3, %p816_p2 }
  0x31   : > { %826 = shalt.err (!%p823_p4)
}
  0x32   : > { %728 = dma.hbm_to_vmem [thread:$0]  (!%p1012_p11), %s1410_s1, 128, %s1008_s22, [#allocation3]  }
  0x33   : > { %s1075_s7 = scalar_select %p1022_p12, %s927_s14, %s70_s26  }
  0x34   : > { %p77_p1 = scmp.ne.s32.totalorder %s927_s14, %s923_s13  ;;  %p78_p2 = scmp.eq.s32.totalorder %s931_s15, 0 }
  0x35   : > { %p739_p4 = scmp.lt.s32.totalorder %s931_s15, 2  ;;  %s153_s23 = sand.u32 1, %s927_s14  }
  0x36   : > { %p79_p6 = por %p78_p2, %p77_p1  ;;  %p1421_p9 = scmp.eq.s32.totalorder %s982_s16, 1 }
  0x37   : > { %s678_s9 = sshll.u32 %s153_s23, 3  ;;  %s708_s10 = sshll.u32 %s931_s15, 7 }
  0x38   : > { %p1084_p0 = por %p1421_p9, %p77_p1  ;;  %s1092_s22 = scalar_lea.hbm %s1411_s2, %s708_s10 }
  0x39   : > { %s157_s26 = scalar_lea.vmem [#allocation7], %s678_s9  ;;  %p1096_p11 = pnand %p739_p4, %p79_p6 }
  0x3a   : > { %s1422_s8 = scalar_select %p1084_p0, 1, 0 }
  0x3b   : > { %s165_s27 = sshll.u32 %s157_s26, 4  ;;  %s154_s25 = scalar_lea.sflag [#allocation8], %s153_s23  ;;  %s1094_s27 = int_to_ptr.vmem [resolvable:$true] %s165_s27 }
  0x3c   : > { %s827_s28 = scalar_lea.hbm %s1092_s22, 128  ;;  %p829_p5 = pneg %p1096_p11 }
  0x3d   : > { %p828_p12 = scmp.ne.s32.totalorder %s1092_s22, %s827_s28  ;;  %s832_s4 = scalar_lea.hbm %s1411_s2, 256 }
  0x3e   : > { %p833_p13 = scmp.lt.u32.totalorder %s1092_s22, %s1411_s2  ;;  %p834_p3 = scmp.lt.u32.totalorder %s832_s4, %s827_s28 }
  0x3f   : > { %p830_p7 = pnand %p829_p5, %p828_p12  ;;  %p836_p2 = scmp.lt.u32.totalorder %s827_s28, %s1092_s22 }
  0x40   : > { %p835_p1 = por %p834_p3, %p833_p13 }
  0x41   : > { %p831_p10 = pneg %p830_p7 }
  0x42   : > { %p837_p4 = por %p836_p2, %p835_p1 }
  0x44   : > { %p838_p6 = pnand %p837_p4, %p831_p10 }
  0x46   : > { %841 = shalt.err (!%p838_p6)
}
  0x47   : > { %s842_s23 = scalar_lea.vmem %s1094_s27, 128  ;;  %s935_s9 = smov [#allocation7]  }
  0x48   : > { %p843_p9 = scmp.ne.s32.totalorder %s1094_s27, %s842_s23  ;;  %s847_s10 = sshll.u32 %s935_s9, 4  ;;  %s848_s10 = int_to_ptr.vmem [resolvable:$false] %s847_s10 }
  0x49   : > { %s849_s11 = scalar_lea.vmem %s848_s10, 256  ;;  %p850_p0 = scmp.lt.s32.totalorder %s1094_s27, %s848_s10 }
  0x4a   : > { %p845_p12 = pnand %p843_p9, %p829_p5  ;;  %p851_p13 = scmp.lt.s32.totalorder %s849_s11, %s842_s23 }
  0x4c   : > { %p846_p7 = pneg %p845_p12  ;;  %p852_p3 = por %p851_p13, %p850_p0 }
  0x4e   : > { %p853_p1 = pnand %p852_p3, %p846_p7 }
  0x50   : > { %856 = shalt.err (!%p853_p1)
}
  0x51   : > { %732 = dma.hbm_to_vmem [thread:$0]  (!%p1096_p11), %s1092_s22, 128, %s1094_s27, %s154_s25  }
  0x52   : > { %174 = sbr.rel (%p1001_p8) target bundleno = 420 (0x1a4), region = 32  ;;  %p1424_p5 = scmp.eq.s32.totalorder (!%p1001_p8), %s982_s16, 0 }
  0x59   : > { %902 = dma.done.wait (%p1424_p5), [#allocation5], 16   ;;  %p1425_p10 = pmov %p1424_p5 }
  0x5a   : > { %p1426_p2 = pmov %p1424_p5 }
  0x5b   : > { %904 = vsyncadd (%p1425_p10), [#allocation5], 4294967280 }
  0x5c   : > { %906 = dma.done.wait (%p1426_p2), [#allocation3], 128   ;;  %p1427_p0 = pmov %p1426_p2 }
  0x5d   : > { %s1136_s17 = sand.u32 1, %s923_s13   ;;  %p1428_p8 = scmp.ne.s32.totalorder %s1416_s18, 0 }
  0x5e   : > { %908 = vsyncadd (%p1427_p0), [#allocation3], 4294967168  ;;  %s684_s20 = sshll.u32 %s1136_s17, 3  ;;  %s185_s22 = scalar_lea.sflag [#allocation8], %s1136_s17 }
  0x5f   : > { %s188_s26 = scalar_lea.vmem [#allocation7], %s684_s20 }
  0x60   : > { %910 = dma.done.wait (%p1428_p8), %s185_s22, 128  }
  0x61   : > { %912 = vsyncadd (%p1428_p8), %s185_s22, 4294967168 }
  0x62   : > { %193 = sfence }
  0x63   : > { %v1146_v0 = vld [vmem:[%s188_s26] sm:$0xff]  ;;  %vm219_vm0 = vcmask 1043456   ;;  %vm252_vm1 = vcmask 1040384   ;;  %s936_s18 = smov 16   ;;  %s937_s27 = smov 112   ;;  %v266_v34 = vlaneseq }
  0x64   : > { %v220_v1 = vsel %vm219_vm0, %v1146_v0, 0.0  ;;  %v236_v2 = vsel %vm219_vm0, %v1146_v0, -inf  ;;  %v217_v3 = vcombine.high %v1146_v0, %v1146_v0  ;;  %s938_s21 = smov 1   ;;  %v255_v39 = vld [vmem:[#allocation6] ss:$4 sm:$0x3] }
  0x65   : > { %v221_v4 = vrot.slane %v220_v1, 4  ;;  %v237_v5 = vrot.slane %v236_v2, 4  ;;  %v281_v35 = vshrl.u32 %v266_v34, 7  ;;  %v1164_v36 = vand.u32 127, %v266_v34  ;;  %s939_s25 = smov 127   ;;  %s1194_s28 = sld [smem:[#allocation2 + $0x1]] }
  0x66   : > { %v227_v6 = vsel %vm219_vm0, %v217_v3, 0.0  ;;  %v243_v7 = vsel %vm219_vm0, %v217_v3, -inf  ;;  %v1170_v40 = vld [vmem:[#allocation6 + $0x1] ss:$4 sm:$0x3]  ;;  %s1196_s29 = sld [smem:[#allocation2 + $0xa]] }
  0x67   : > { %v222_v8 = vadd.f32 %v221_v4, %v220_v1  ;;  %v238_v9 = vmax.f32 %v236_v2, %v237_v5  ;;  %v228_v10 = vrot.slane %v227_v6, 4  ;;  %v244_v11 = vrot.slane %v243_v7, 4  ;;  %s1198_s30 = sld [smem:[#allocation2 + $0x7]]  ;;  %s1200_s4 = sld [smem:[#allocation2 + $0x10]] }
  0x68   : > { %v1166_v37 = vsub.s32 0, %v281_v35  ;;  %v1168_v38 = vsub.s32 1, %v281_v35  ;;  %vm268_vm2 = vcmp.lt.s32.totalorder %v1164_v36, 16  ;;  %vm440_vm3 = vcmp.lt.s32.totalorder %v1164_v36, 112  ;;  %s1202_s5 = sld [smem:[#allocation2 + $0x3]]  ;;  %s1204_s6 = sld [smem:[#allocation2 + $0xc]] }
  0x69   : > { %v223_v12 = vrot.slane %v222_v8, 2  ;;  %v239_v13 = vrot.slane %v238_v9, 2  ;;  %v229_v14 = vadd.f32 %v228_v10, %v227_v6  ;;  %v245_v15 = vmax.f32 %v243_v7, %v244_v11  ;;  %s1206_s23 = sld [smem:[#allocation2]]  ;;  %v259_v57 = vld [vmem:[#allocation6 + $0x2] ss:$4 sm:$0x3] }
  0x6a   : > { %v308_v43 = vrot.slane %v255_v39, %v1166_v37  ;;  %v312_v44 = vrot.slane %v255_v39, %v1168_v38  ;;  %v479_v45 = vrot.slane %v1170_v40, %v1166_v37  ;;  %v483_v46 = vrot.slane %v1170_v40, %v1168_v38  ;;  %s1208_s9 = sld [smem:[#allocation2 + $0x4]]  ;;  %s1210_s10 = sld [smem:[#allocation2 + $0xd]]  ;;  %v1214_v58 = vld [vmem:[#allocation6 + $0x3] ss:$4 sm:$0x3] }
  0x6b   : > { %v224_v16 = vadd.f32 %v223_v12, %v222_v8  ;;  %v240_v17 = vmax.f32 %v238_v9, %v239_v13  ;;  %v230_v18 = vrot.slane %v229_v14, 2  ;;  %v246_v19 = vrot.slane %v245_v15, 2  ;;  %s1212_s11 = sld [smem:[#allocation2 + $0x9]]  ;;  %s1216_s22 = sld [smem:[#allocation2 + $0x2]] }
  0x6c   : > { %s1218_s26 = sld [smem:[#allocation2 + $0xb]]  ;;  %v278_v59 = vmul.f32 %v259_v57, %v255_v39  ;;  %v318_v60 = vstv %s1194_s28  ;;  %v324_v61 = vstv %s1196_s29  ;;  %v1227_v62 = vmul.f32 %v1214_v58, %v255_v39  ;;  %s1304_s28 = sld [smem:[#allocation2 + $0x8]] }
  0x6d   : > { %v225_v20 = vrot.slane %v224_v16, 1  ;;  %v241_v21 = vrot.slane %v240_v17, 1  ;;  %v231_v22 = vadd.f32 %v230_v18, %v229_v14  ;;  %v247_v23 = vmax.f32 %v245_v15, %v246_v19  ;;  %s1306_s29 = sld [smem:[#allocation2 + $0x11]]  ;;  %p1429_p4 = scmp.ne.s32.totalorder %s1422_s8, 0 }
  0x6e   : > { %v489_v63 = vstv %s1198_s30  ;;  %v495_v1 = vstv %s1200_s4  ;;  %vm275_vm4 = vcmp.lt.s32.totalorder %v1164_v36, 1  ;;  %v372_v3 = vrot.slane %v259_v57, %v1166_v37  ;;  %s709_s30 = sshll.u32 %s982_s16, 7  ;;  %s211_s4 = scalar_lea.vmem [#allocation9], %s684_s20 }
  0x6f   : > { %v226_v24 = vadd.f32 %v225_v20, %v224_v16  ;;  %v242_v25 = vmax.f32 %v240_v17, %v241_v21  ;;  %v232_v26 = vrot.slane %v231_v22, 1  ;;  %v248_v27 = vrot.slane %v247_v23, 1  ;;  %s940_s16 = smov [#allocation9]  }
  0x70   : > { %v376_v5 = vrot.slane %v259_v57, %v1168_v38  ;;  %v382_v6 = vstv %s1202_s5  ;;  %v388_v7 = vstv %s1204_s6  ;;  %v283_v8 = vrot.slane %v278_v59, %v1166_v37  ;;  %s579_s5 = sshll.u32 %s211_s4, 4  ;;  %s861_s20 = sshll.u32 %s940_s16, 4  ;;  %s1367_s5 = int_to_ptr.vmem [resolvable:$true] %s579_s5  ;;  %s862_s20 = int_to_ptr.vmem [resolvable:$false] %s861_s20 }
  0x71   : > { %v250_v28 = vmul.f32 0.25, %v226_v24  ;;  %v233_v29 = vadd.f32 %v232_v26, %v231_v22  ;;  %v249_v30 = vmax.f32 %v247_v23, %v248_v27  ;;  %v287_v9 = vrot.slane %v278_v59, %v1168_v38  ;;  %p864_p12 = scmp.lt.s32.totalorder %s1367_s5, %s862_s20 }
  0x72   : > { %v293_v10 = vstv %s1206_s23  ;;  %v394_v11 = vstv %s1208_s9  ;;  %v400_v12 = vstv %s1210_s10  ;;  %v299_v13 = vstv %s1212_s11  ;;  %s1365_s9 = scalar_lea.hbm %s1412_s3, %s709_s30  ;;  %s565_s10 = scalar_lea.sflag [#allocation4], %s1136_s17 }
  0x73   : > { %v1152_v31 = vsel %vm252_vm1, %v250_v28, %v242_v25  ;;  %v251_v32 = vmul.f32 0.25, %v233_v29  ;;  %vm333_vm5 = vcmp.lt.s32.totalorder %v1164_v36, 127  ;;  %v341_v14 = vrot.slane %v1227_v62, %v1166_v37  ;;  %s857_s11 = scalar_lea.vmem %s1367_s5, 128 }
  0x74   : > { %262 = vrot.lane.b32.xlu0 %v1152_v31, %s936_s18  ;;  %436 = vrot.lane.b32.xlu1 %v1152_v31, %s937_s27  ;;  %v345_v15 = vrot.slane %v1227_v62, %v1168_v38  ;;  %v351_v16 = vstv %s1216_s22  ;;  %v357_v17 = vstv %s1218_s26  ;;  %v415_v18 = vrot.slane %v1214_v58, %v1166_v37  ;;  %p858_p11 = scmp.ne.s32.totalorder %s1367_s5, %s857_s11  ;;  %s863_s22 = scalar_lea.vmem %s862_s20, 256 }
  0x75   : > { %v1156_v33 = vsel %vm252_vm1, %v251_v32, %v249_v30  ;;  %v419_v19 = vrot.slane %v1214_v58, %v1168_v38  ;;  %v1256_v20 = vmul.f32 %v394_v11, %v1152_v31  ;;  %v1259_v21 = vmul.f32 %v400_v12, %v1152_v31  ;;  %p865_p7 = scmp.lt.s32.totalorder %s863_s22, %s857_s11 }
  0x76   : > { %v1263_v23 = vmul.f32 %v259_v57, %v1170_v40  ;;  %p859_p6 = pnand %p858_p11, %p1429_p4 }
  0x77   : > { %p866_p13 = por %p865_p7, %p864_p12 }
  0x78   : > { %264 = vrot.lane.b32.xlu0 %v1156_v33, %s936_s18  ;;  %438 = vrot.lane.b32.xlu1 %v1156_v33, %s937_s27  ;;  %s1220_s18 = sld [smem:[#allocation2 + $0x5]]  ;;  %s1222_s27 = sld [smem:[#allocation2 + $0xe]] }
  0x79   : > { %p860_p9 = pneg %p859_p6 }
  0x7b   : > { %p867_p3 = pnand %p866_p13, %p860_p9 }
  0x7c   : > { %364 = vrot.lane.b32.xlu1 %v1156_v33, %s938_s21  ;;  %362 = vrot.lane.b32.xlu0 %v1152_v31, %s938_s21 }
  0x7e   : > { %v425_v22 = vstv %s1220_s18  ;;  %v431_v29 = vstv %s1222_s27 }
  0xe6   : > { %v263_v41 = vpop.permute.xlu0 %262  ;;  %v437_v42 = vpop.permute.xlu1 %436 }
  0xea   : > { %v265_v47 = vpop.permute.xlu0 %264  ;;  %v439_v48 = vpop.permute.xlu1 %438 }
  0xeb   : > { %v270_v49 = vsel %vm268_vm2, %v265_v47, %v263_v41  ;;  %v269_v50 = vsel %vm268_vm2, %v263_v41, %v265_v47  ;;  %v441_v51 = vsel %vm440_vm3, %v437_v42, %v439_v48  ;;  %v442_v52 = vsel %vm440_vm3, %v439_v48, %v437_v42 }
  0xec   : > { %271 = vrot.lane.b32.xlu0 %v270_v49, %s938_s21  ;;  %v1181_v53 = vmul.f32 %v308_v43, %v270_v49  ;;  %273 = vrot.lane.b32.xlu1 %v269_v50, %s938_s21  ;;  %v1184_v54 = vmul.f32 %v312_v44, %v269_v50  ;;  %v1186_v55 = vmul.f32 %v479_v45, %v441_v51 }
  0xed   : > { %v1188_v56 = vmul.f32 %v483_v46, %v442_v52  ;;  %v396_v46 = vmul.f32 %v394_v11, %v1156_v33 }
  0xee   : > { %v365_v2 = vpop.permute.xlu1 %364  ;;  %v363_v4 = vpop.permute.xlu0 %362  ;;  %v319_v24 = vmul.f32 %v318_v60, %v1181_v53  ;;  %v325_v30 = vmul.f32 %v324_v61, %v1181_v53  ;;  %v326_v35 = vmul.f32 %v324_v61, %v1184_v54  ;;  %v1283_v39 = vmul.f32 %v489_v63, %v1186_v55 }
  0xef   : > { %v366_v25 = vsel %vm275_vm4, %v363_v4, %v365_v2  ;;  %v367_v26 = vsel %vm275_vm4, %v365_v2, %v363_v4  ;;  %v1288_v43 = vmul.f32 %v495_v1, %v1186_v55  ;;  %v402_v55 = vmul.f32 %v400_v12, %v1156_v33 }
  0xf0   : > { %329 = vrot.lane.b32.xlu0 %v270_v49, %s939_s25  ;;  %331 = vrot.lane.b32.xlu1 %v269_v50, %s939_s25  ;;  %v379_v44 = vmul.f32 %v372_v3, %v367_v26  ;;  %v380_v45 = vmul.f32 %v376_v5, %v366_v25  ;;  %v454_v4 = vrot.slane %v1263_v23, %v1166_v37 }
  0xf1   : > { %v458_v5 = vrot.slane %v1263_v23, %v1168_v38  ;;  %v506_v12 = vmul.f32 %v1214_v58, %v1170_v40 }
  0xf2   : > { %v389_v25 = vmul.f32 %v388_v7, %v379_v44  ;;  %v390_v23 = vmul.f32 %v388_v7, %v380_v45 }
  0xf4   : > { %405 = vrot.lane.b32.xlu0 %v1152_v31, %s939_s25  ;;  %407 = vrot.lane.b32.xlu1 %v1156_v33, %s939_s25  ;;  %v320_v31 = vmul.f32 %v318_v60, %v1184_v54 }
  0xf8   : > { %443 = vrot.lane.b32.xlu0 %v441_v51, %s938_s21  ;;  %445 = vrot.lane.b32.xlu1 %v442_v52, %s938_s21  ;;  %s1247_s21 = sld [smem:[#allocation2 + $0x6]] }
  0xfc   : > { %500 = vrot.lane.b32.xlu0 %v441_v51, %s939_s25  ;;  %502 = vrot.lane.b32.xlu1 %v442_v52, %s939_s25  ;;  %s1271_s25 = sld [smem:[#allocation2 + $0xf]] }
  0xfe   : > { %v464_v57 = vstv %s1247_s21 }
 0x102   : > { %v470_v33 = vstv %s1271_s25 }
 0x15e   : > { %v274_v27 = vpop.permute.xlu1 %273  ;;  %v272_v28 = vpop.permute.xlu0 %271 }
 0x15f   : > { %v276_v32 = vsel %vm275_vm4, %v272_v28, %v274_v27  ;;  %v277_v34 = vsel %vm275_vm4, %v274_v27, %v272_v28 }
 0x160   : > { %v290_v41 = vmul.f32 %v283_v8, %v277_v34  ;;  %v291_v42 = vmul.f32 %v287_v9, %v276_v32  ;;  %v383_v8 = vmul.f32 %v382_v6, %v379_v44  ;;  %v384_v9 = vmul.f32 %v382_v6, %v380_v45 }
 0x161   : > { %v511_v32 = vrot.slane %v506_v12, %v1166_v37  ;;  %v515_v34 = vrot.slane %v506_v12, %v1168_v38 }
 0x162   : > { %v294_v47 = vmul.f32 %v293_v10, %v290_v41  ;;  %v295_v48 = vmul.f32 %v293_v10, %v291_v42  ;;  %v300_v49 = vmul.f32 %v299_v13, %v290_v41  ;;  %v301_v50 = vmul.f32 %v299_v13, %v291_v42  ;;  %v332_v51 = vpop.permute.xlu1 %331  ;;  %v330_v52 = vpop.permute.xlu0 %329 }
 0x163   : > { %v334_v53 = vsel %vm333_vm5, %v330_v52, %v332_v51  ;;  %v335_v54 = vsel %vm333_vm5, %v332_v51, %v330_v52 }
 0x164   : > { %v321_v59 = vadd.f32 %v319_v24, %v294_v47  ;;  %v322_v60 = vadd.f32 %v320_v31, %v295_v48  ;;  %v327_v61 = vadd.f32 %v325_v30, %v300_v49  ;;  %v328_v62 = vadd.f32 %v326_v35, %v301_v50 }
 0x165   : > { %v348_v2 = vmul.f32 %v341_v14, %v334_v53  ;;  %v349_v3 = vmul.f32 %v345_v15, %v335_v54  ;;  %v527_v53 = vstv %s1306_s29 }
 0x166   : > { %v408_v10 = vpop.permute.xlu1 %407  ;;  %v406_v11 = vpop.permute.xlu0 %405 }
 0x167   : > { %v352_v13 = vmul.f32 %v351_v16, %v348_v2  ;;  %v353_v14 = vmul.f32 %v351_v16, %v349_v3  ;;  %v358_v15 = vmul.f32 %v357_v17, %v348_v2  ;;  %v359_v24 = vmul.f32 %v357_v17, %v349_v3 }
 0x168   : > { %v409_v6 = vsel %vm333_vm5, %v406_v11, %v408_v10  ;;  %v410_v26 = vsel %vm333_vm5, %v408_v10, %v406_v11  ;;  %v497_v2 = vmul.f32 %v495_v1, %v1188_v56 }
 0x169   : > { %v354_v40 = vadd.f32 %v352_v13, %v321_v59  ;;  %v355_v27 = vadd.f32 %v353_v14, %v322_v60  ;;  %v360_v28 = vadd.f32 %v358_v15, %v327_v61  ;;  %v361_v16 = vadd.f32 %v359_v24, %v328_v62 }
 0x16a   : > { %v422_v17 = vmul.f32 %v415_v18, %v409_v6  ;;  %v423_v7 = vmul.f32 %v419_v19, %v410_v26  ;;  %v446_v30 = vpop.permute.xlu1 %445  ;;  %v444_v31 = vpop.permute.xlu0 %443  ;;  %v491_v62 = vmul.f32 %v489_v63, %v1188_v56 }
 0x16b   : > { %v385_v35 = vadd.f32 %v383_v8, %v354_v40  ;;  %v386_v41 = vadd.f32 %v384_v9, %v355_v27  ;;  %v391_v42 = vadd.f32 %v389_v25, %v360_v28  ;;  %v392_v44 = vadd.f32 %v390_v23, %v361_v16 }
 0x16c   : > { %v426_v45 = vmul.f32 %v425_v22, %v422_v17  ;;  %v427_v18 = vmul.f32 %v425_v22, %v423_v7  ;;  %v432_v47 = vmul.f32 %v431_v29, %v422_v17  ;;  %v433_v58 = vmul.f32 %v431_v29, %v423_v7 }
 0x16d   : > { %v397_v19 = vadd.f32 %v1256_v20, %v385_v35  ;;  %v403_v48 = vadd.f32 %v1259_v21, %v391_v42  ;;  %v398_v49 = vadd.f32 %v396_v46, %v386_v41  ;;  %v404_v38 = vadd.f32 %v402_v55, %v392_v44 }
 0x16e   : > { %v447_v50 = vsel %vm275_vm4, %v444_v31, %v446_v30  ;;  %v448_v51 = vsel %vm275_vm4, %v446_v30, %v444_v31  ;;  %v503_v52 = vpop.permute.xlu1 %502  ;;  %v521_v22 = vstv %s1304_s28  ;;  %v501_v29 = vpop.permute.xlu0 %500 }
 0x16f   : > { %v428_v54 = vadd.f32 %v426_v45, %v397_v19  ;;  %v429_v20 = vadd.f32 %v427_v18, %v398_v49  ;;  %v434_v59 = vadd.f32 %v432_v47, %v403_v48  ;;  %v435_v21 = vadd.f32 %v433_v58, %v404_v38 }
 0x170   : > { %v461_v46 = vmul.f32 %v454_v4, %v448_v51  ;;  %v462_v60 = vmul.f32 %v458_v5, %v447_v50  ;;  %v504_v55 = vsel %vm333_vm5, %v501_v29, %v503_v52  ;;  %v505_v61 = vsel %vm333_vm5, %v503_v52, %v501_v29 }
 0x171   : > { %v518_v3 = vmul.f32 %v511_v32, %v504_v55  ;;  %v519_v8 = vmul.f32 %v515_v34, %v505_v61 }
 0x172   : > { %v465_v9 = vmul.f32 %v464_v57, %v461_v46  ;;  %v466_v10 = vmul.f32 %v464_v57, %v462_v60  ;;  %v471_v4 = vmul.f32 %v470_v33, %v461_v46  ;;  %v472_v5 = vmul.f32 %v470_v33, %v462_v60 }
 0x173   : > { %v522_v11 = vmul.f32 %v521_v22, %v518_v3  ;;  %v523_v12 = vmul.f32 %v521_v22, %v519_v8  ;;  %v528_v13 = vmul.f32 %v527_v53, %v518_v3  ;;  %v529_v14 = vmul.f32 %v527_v53, %v519_v8 }
 0x174   : > { %v467_v36 = vadd.f32 %v465_v9, %v428_v54  ;;  %v468_v15 = vadd.f32 %v466_v10, %v429_v20  ;;  %v473_v24 = vadd.f32 %v471_v4, %v434_v59  ;;  %v474_v25 = vadd.f32 %v472_v5, %v435_v21 }
 0x176   : > { %v492_v63 = vadd.f32 %v1283_v39, %v467_v36  ;;  %v498_v56 = vadd.f32 %v1288_v43, %v473_v24  ;;  %v493_v1 = vadd.f32 %v491_v62, %v468_v15  ;;  %v499_v23 = vadd.f32 %v497_v2, %v474_v25 }
 0x178   : > { %v524_v6 = vadd.f32 %v522_v11, %v492_v63  ;;  %v525_v26 = vadd.f32 %v523_v12, %v493_v1  ;;  %v530_v40 = vadd.f32 %v528_v13, %v498_v56  ;;  %v531_v57 = vadd.f32 %v529_v14, %v499_v23 }
 0x17a   : > { %v534_v27 = vrot.slane %v530_v40, 1  ;;  %v535_v33 = vrot.slane %v531_v57, 1 }
 0x17c   : > { %v538_v28 = vadd.f32 %v534_v27, %v524_v6  ;;  %v539_v16 = vadd.f32 %v535_v33, %v525_v26 }
 0x17e   : > { %v540_v17 = vmul.f32 0.5, %v538_v28  ;;  %v541_v7 = vmul.f32 0.5, %v539_v16 }
 0x180   : > { %782 = vtanh.f32 %v540_v17 }
 0x181   : > { %784 = vtanh.f32 %v541_v7 }
 0x18a   : > { %v783_v30 = vpop.eup %782 }
 0x18b   : > { %v785_v39 = vpop.eup %784  ;;  %v544_v43 = vmul.f32 0.5, %v783_v30 }
 0x18c   : > { %v545_v31 = vmul.f32 0.5, %v785_v39 }
 0x18d   : > { %v546_v32 = vadd.f32 0.5, %v544_v43 }
 0x18e   : > { %v547_v34 = vadd.f32 0.5, %v545_v31 }
 0x18f   : > { %v551_v35 = vrot.slane %v546_v32, %v1166_v37 }
 0x190   : > { %v555_v41 = vrot.slane %v547_v34, %v1166_v37 }
 0x192   : > { %v558_v42 = vcombine.low %v551_v35, %v555_v41 }
 0x194   : > { %v560_v44 = vmul.f32 %v558_v42, %v1146_v0 }
 0x196   : > { %563 = vst [vmem:[%s211_s4] sm:$0xff] %v560_v44 }
 0x197   : > { %870 = shalt.err (!%p867_p3)
}
 0x198   : > { %s871_s17 = scalar_lea.hbm %s1365_s9, 128  ;;  %s875_s27 = scalar_lea.hbm %s1412_s3, 256 }
 0x199   : > { %p872_p1 = scmp.ne.s32.totalorder %s1365_s9, %s871_s17  ;;  %p876_p2 = scmp.lt.u32.totalorder %s1365_s9, %s1412_s3 }
 0x19a   : > { %p877_p0 = scmp.lt.u32.totalorder %s875_s27, %s871_s17  ;;  %p879_p11 = scmp.lt.u32.totalorder %s871_s17, %s1365_s9 }
 0x19b   : > { %p873_p5 = pnand %p872_p1, %p1429_p4 }
 0x19c   : > { %p878_p8 = por %p877_p0, %p876_p2 }
 0x19d   : > { %p874_p10 = pneg %p873_p5 }
 0x19e   : > { %p880_p6 = por %p879_p11, %p878_p8 }
 0x1a0   : > { %p881_p9 = pnand %p880_p6, %p874_p10 }
 0x1a2   : > { %884 = shalt.err (!%p881_p9)
}
 0x1a3   : > { %720 = dma.vmem_to_hbm [thread:$0]  (%p1429_p4), %s1367_s5, 128, %s1365_s9, %s565_s10  }
 0x1a4 PF: > { %s591_s28 = sand.u32 1, %s919_s12   ;;  %p1430_p12 = scmp.ne.s32.totalorder %s1417_s19, 0 }
 0x1a5   : > { %p1431_p7 = scmp.ge.s32.totalorder %s931_s15, 2  ;;  %s592_s29 = scalar_lea.sflag [#allocation4], %s591_s28 }
 0x1a7   : > { %p734_p13 = pnand %p1431_p7, %p1430_p12 }
 0x1a9   : > { %914 = dma.done.wait (!%p734_p13), %s592_s29, 128  }
 0x1aa   : > { %916 = vsyncadd (!%p734_p13), %s592_s29, 4294967168  ;;  %p18_p3 = scmp.ge.s32.totalorder %s1017_s24, 4   ;;  %s1432_s12 = smov %s923_s13 }
 0x1ab   : > { %s1433_s13 = smov %s927_s14  ;;  %s1434_s14 = smov %s1075_s7 }
 0x1ac   : > { %s1435_s15 = smov %s1017_s24  ;;  %20 = sbr.rel (!%p18_p3) target bundleno = 7 (0x7), region = 92 }
 0x1b3   :  { %597 = vsyncpa [#allocation3], 1 }
 0x1b4   :  { %599 = vsyncpa [#allocation3 + $0x1], 1 }
 0x1b5   :  { %600 = vsyncpa [#allocation8], 1 }
 0x1b6   :  { %602 = vsyncpa [#allocation8 + $0x1], 1 }
 0x1b7   :  { %603 = vsyncpa [#allocation4], 1 }
 0x1b8   :  { %605 = vsyncpa [#allocation4 + $0x1], 1 }
 0x1b9   :  { %606 = vsyncpa [#allocation5], 1 }
 0x1ba   :  { %608 = vsyncpa [#allocation5 + $0x1], 1 }

</bundles_post_ra>
